<compile_context>
chip_gen: v5e
topology: v5e:2x2
jax: 0.10.0
libtpu: 0.0.40
codegen_flags: <defaults>
</compile_context>

<pallas_src>
import math
import functools

import jax
import jax.numpy as jnp
from jax import lax
from jax.experimental import pallas as pl
from jax.experimental.pallas import tpu as pltpu

_VMEM_LIMIT_BYTES = 48 * 1024 * 1024


def _qkv_proj_kernel(x_ref, w_in_ref, b_in_ref, q_ref, k_ref, v_ref,
                     *, n_heads: int, scale: float):
    x = x_ref[0]                                    # (tq, D)
    T, D = x.shape
    dh = D // n_heads

    # in_proj: (tq, D) @ (D, 3D) + (1, 3D), f32 accumulation.
    qkv = jnp.dot(x, w_in_ref[...], preferred_element_type=jnp.float32)
    qkv = qkv + b_in_ref[...]

    q_all = qkv[:, 0 * D:1 * D] * scale             # fold 1/sqrt(dh) into q
    k_all = qkv[:, 1 * D:2 * D]
    v_all = qkv[:, 2 * D:3 * D]

    # Head split amortized: paid once per (batch, q-tile) here instead of per
    # (batch, q-tile, kv-tile, head) inside the attention loop.
    for h in range(n_heads):
        sl = slice(h * dh, (h + 1) * dh)
        q_ref[0, h] = q_all[:, sl].astype(q_ref.dtype)
        k_ref[0, h] = k_all[:, sl].astype(k_ref.dtype)
        v_ref[0, h] = v_all[:, sl].astype(v_ref.dtype)


def _flash_attn_outproj_kernel(q_ref, k_ref, v_ref, w_out_ref, b_out_ref,
                               o_ref, m_sc, l_sc, acc_sc,
                               *, causal: bool, tq: int, tk: int):
    ki = pl.program_id(2)

    @pl.when(ki == 0)
    def _():
        m_sc[...] = jnp.full_like(m_sc, -jnp.inf)
        l_sc[...] = jnp.zeros_like(l_sc)
        acc_sc[...] = jnp.zeros_like(acc_sc)

    q = q_ref[0]                                    # (H, tq, dh), pre-scaled
    k = k_ref[0]                                    # (H, tk, dh)
    v = v_ref[0]                                    # (H, tk, dh)

    # Batched-head scores; contraction over the shared last dim => no .T.
    s = jnp.einsum('hqd,hkd->hqk', q, k,
                   preferred_element_type=jnp.float32)      # (H, tq, tk) f32

    if causal:
        qi = pl.program_id(1)
        q_pos = qi * tq + lax.broadcasted_iota(jnp.int32, (tq, tk), 0)
        k_pos = ki * tk + lax.broadcasted_iota(jnp.int32, (tq, tk), 1)
        # Mask built once per grid step (not per head); -inf matches PyTorch's
        # masked_fill semantics.  kv tile 0 always has an unmasked column for
        # every query row, so the online-softmax max stays finite.
        s = jnp.where((k_pos > q_pos)[None, :, :], -jnp.inf, s)

    # Online softmax (f32 throughout).
    m_prev = m_sc[...]
    m_new = jnp.maximum(m_prev, jnp.max(s, axis=-1, keepdims=True))
    alpha = jnp.exp(m_prev - m_new)
    p = jnp.exp(s - m_new)
    l_sc[...] = alpha * l_sc[...] + jnp.sum(p, axis=-1, keepdims=True)
    acc_sc[...] = alpha * acc_sc[...] + jnp.einsum(
        'hqk,hkd->hqd', p.astype(v.dtype), v,
        preferred_element_type=jnp.float32)
    m_sc[...] = m_new

    @pl.when(ki == pl.num_programs(2) - 1)
    def _():
        inv_l = pl.reciprocal(l_sc[...], approx=True)        # EUP, not VALU
        o_heads = (acc_sc[...] * inv_l).astype(w_out_ref.dtype)   # (H, tq, dh)
        # Fused out_proj: head concat + (S, D)@(D, D) as a single contraction
        # over (h, d) against W_out reshaped to (H, dh, D).
        out = jnp.einsum('hqd,hde->qe', o_heads, w_out_ref[...],
                         preferred_element_type=jnp.float32)
        out = out + b_out_ref[...]
        o_ref[0] = out.astype(o_ref.dtype)


def _pick_tile(S: int, target: int) -> int:
    if S <= target:
        return S
    for t in range(target, 7, -8):
        if S % t == 0:
            return t
    return S


def self_attention(x, w_in, b_in, w_out, b_out, n_heads: int,
                   causal_mask: bool = False, *,
                   compute_dtype=None, tile_q: int = 128, tile_kv: int = 128):
    """x: (B, S, D); w_in: (3D, D) / w_out: (D, D) in PyTorch (out, in) layout."""
    B, S, D = x.shape
    assert D % n_heads == 0
    dh = D // n_heads
    cdt = jnp.dtype(compute_dtype) if compute_dtype is not None else x.dtype
    scale = 1.0 / math.sqrt(dh)

    tq = _pick_tile(S, tile_q)
    tk = _pick_tile(S, tile_kv)
    assert S % tq == 0 and S % tk == 0

    x_c = x.astype(cdt)
    w_in_t = jnp.asarray(w_in).T.astype(cdt)                         # (D, 3D)
    b_in_2d = jnp.asarray(b_in).reshape(1, 3 * D).astype(jnp.float32)
    # (D_in, D_out) -> (H, dh, D): head-major weight so out_proj fuses cleanly.
    w_out_h = jnp.asarray(w_out).T.reshape(n_heads, dh, D).astype(cdt)
    b_out_2d = jnp.asarray(b_out).reshape(1, D).astype(jnp.float32)

    # ---- Stage 1: fused in_proj + head split (+ q scaling). ----
    qkv_kernel = functools.partial(_qkv_proj_kernel,
                                   n_heads=n_heads, scale=scale)
    hshape = jax.ShapeDtypeStruct((B, n_heads, S, dh), cdt)
    head_spec = pl.BlockSpec((1, n_heads, tq, dh), lambda b, i: (b, 0, i, 0))
    q_h, k_h, v_h = pl.pallas_call(
        qkv_kernel,
        out_shape=(hshape, hshape, hshape),
        grid=(B, S // tq),
        in_specs=[
            pl.BlockSpec((1, tq, D), lambda b, i: (b, i, 0)),
            pl.BlockSpec((D, 3 * D), lambda b, i: (0, 0)),
            pl.BlockSpec((1, 3 * D), lambda b, i: (0, 0)),
        ],
        out_specs=(head_spec, head_spec, head_spec),
        compiler_params=pltpu.CompilerParams(
            dimension_semantics=("parallel", "parallel"),
            vmem_limit_bytes=_VMEM_LIMIT_BYTES),
    )(x_c, w_in_t, b_in_2d)

    # ---- Stage 2: flash-style attention + fused out_proj. ----
    attn_kernel = functools.partial(_flash_attn_outproj_kernel,
                                    causal=causal_mask, tq=tq, tk=tk)
    out = pl.pallas_call(
        attn_kernel,
        out_shape=jax.ShapeDtypeStruct((B, S, D), x.dtype),
        grid=(B, S // tq, S // tk),
        in_specs=[
            pl.BlockSpec((1, n_heads, tq, dh), lambda b, i, j: (b, 0, i, 0)),
            pl.BlockSpec((1, n_heads, tk, dh), lambda b, i, j: (b, 0, j, 0)),
            pl.BlockSpec((1, n_heads, tk, dh), lambda b, i, j: (b, 0, j, 0)),
            pl.BlockSpec((n_heads, dh, D), lambda b, i, j: (0, 0, 0)),
            pl.BlockSpec((1, D), lambda b, i, j: (0, 0)),
        ],
        out_specs=pl.BlockSpec((1, tq, D), lambda b, i, j: (b, i, 0)),
        scratch_shapes=[
            pltpu.VMEM((n_heads, tq, 1), jnp.float32),    # running max m
            pltpu.VMEM((n_heads, tq, 1), jnp.float32),    # running sum l
            pltpu.VMEM((n_heads, tq, dh), jnp.float32),   # output accumulator
        ],
        compiler_params=pltpu.CompilerParams(
            dimension_semantics=("parallel", "parallel", "arbitrary"),
            vmem_limit_bytes=_VMEM_LIMIT_BYTES),
    )(q_h, k_h, v_h, w_out_h, b_out_2d)
    return out


def _reference(x, w_in, b_in, w_out, b_out, n_heads, causal_mask=False):
    """Pure-JAX reference mirroring the PyTorch forward."""
    B, S, D = x.shape
    dh = D // n_heads
    qkv = jnp.einsum('bsd,ed->bse', x, w_in) + b_in
    q, k, v = jnp.split(qkv, 3, axis=-1)

    def heads(t):  # (B,S,D) -> (B,H,S,dh)
        return t.reshape(B, S, n_heads, dh).transpose(0, 2, 1, 3)

    q, k, v = heads(q), heads(k), heads(v)
    w = jnp.einsum('bhqd,bhkd->bhqk', q, k)
    if causal_mask:
        mask = jnp.triu(jnp.ones((S, S), bool), 1)
        w = jnp.where(mask, -jnp.inf, w)
    w = w / math.sqrt(dh)
    w = jax.nn.softmax(w, axis=-1)
    o = jnp.einsum('bhqk,bhkd->bhqd', w, v)
    o = o.transpose(0, 2, 1, 3).reshape(B, S, D)
    return jnp.einsum('bsd,ed->bse', o, w_out) + b_out


if __name__ == "__main__":
    B, S, D, H = 2, 8, 32, 4

    key = jax.random.PRNGKey(0)
    kx, k1, k2, k3, k4, kx2 = jax.random.split(key, 6)

    bound = 1.0 / math.sqrt(D)
    x = jax.random.normal(kx, (B, S, D), dtype=jnp.float32)
    w_in = jax.random.uniform(k1, (3 * D, D), jnp.float32, -bound, bound)
    b_in = jax.random.uniform(k2, (3 * D,), jnp.float32, -bound, bound)
    w_out = jax.random.uniform(k3, (D, D), jnp.float32, -bound, bound)
    b_out = jax.random.uniform(k4, (D,), jnp.float32, -bound, bound)

    # 1) non-causal, single tile.
    out = jax.block_until_ready(
        self_attention(x, w_in, b_in, w_out, b_out, n_heads=H,
                       causal_mask=False))
    ref = _reference(x, w_in, b_in, w_out, b_out, H, causal_mask=False)
    assert out.shape == (B, S, D)
    assert jnp.allclose(out, ref, atol=1e-2, rtol=1e-2), "non-causal mismatch"

    # 2) causal, single tile.
    out_c = jax.block_until_ready(
        self_attention(x, w_in, b_in, w_out, b_out, n_heads=H,
                       causal_mask=True))
    ref_c = _reference(x, w_in, b_in, w_out, b_out, H, causal_mask=True)
    assert jnp.allclose(out_c, ref_c, atol=1e-2, rtol=1e-2), "causal mismatch"

    # 3) causal with multiple q/kv tiles (exercises online-softmax accumulation
    #    and cross-tile causal masking).
    S2 = 16
    x2 = jax.random.normal(kx2, (B, S2, D), dtype=jnp.float32)
    out_t = jax.block_until_ready(
        self_attention(x2, w_in, b_in, w_out, b_out, n_heads=H,
                       causal_mask=True, tile_q=8, tile_kv=8))
    ref_t = _reference(x2, w_in, b_in, w_out, b_out, H, causal_mask=True)
    assert jnp.allclose(out_t, ref_t, atol=1e-2, rtol=1e-2), "tiled causal mismatch"

    print("KERNEL_OK")
</pallas_src>

<mosaic_0001>
module attributes {stable_mosaic.version = 11 : i64} {
  func.func @_qkv_proj_kernel(%arg0: i32, %arg1: i32, %arg2: memref<1x8x32xf32, #tpu.memory_space<vmem>>, %arg3: memref<32x96xf32, #tpu.memory_space<vmem>>, %arg4: memref<1x96xf32, #tpu.memory_space<vmem>>, %arg5: memref<1x4x8x8xf32, #tpu.memory_space<vmem>>, %arg6: memref<1x4x8x8xf32, #tpu.memory_space<vmem>>, %arg7: memref<1x4x8x8xf32, #tpu.memory_space<vmem>>) attributes {dimension_semantics = [#tpu.dimension_semantics<parallel>, #tpu.dimension_semantics<parallel>], iteration_bounds = array<i64: 2, 1>, scalar_prefetch = 0 : i64, scratch_operands = 0 : i64, tpu.core_type = #tpu.core_type<tc>, window_params = [{transform_indices = @transform_0, window_bounds = array<i64: 1, 8, 32>}, {pipeline_mode = #tpu.pipeline_mode<synchronous>, transform_indices = @transform_1, window_bounds = array<i64: 32, 96>}, {pipeline_mode = #tpu.pipeline_mode<synchronous>, transform_indices = @transform_2, window_bounds = array<i64: 1, 96>}, {transform_indices = @transform_3, window_bounds = array<i64: 1, 4, 8, 8>}, {transform_indices = @transform_4, window_bounds = array<i64: 1, 4, 8, 8>}, {transform_indices = @transform_5, window_bounds = array<i64: 1, 4, 8, 8>}]} {
    %c0 = arith.constant 0 : index
    %c0_0 = arith.constant 0 : index
    %c0_1 = arith.constant 0 : index
    %0 = vector.load %arg2[%c0, %c0_0, %c0_1] : memref<1x8x32xf32, #tpu.memory_space<vmem>>, vector<1x8x32xf32>
    %1 = vector.shape_cast %0 : vector<1x8x32xf32> to vector<8x32xf32>
    %c0_2 = arith.constant 0 : index
    %c0_3 = arith.constant 0 : index
    %2 = vector.load %arg3[%c0_2, %c0_3] : memref<32x96xf32, #tpu.memory_space<vmem>>, vector<32x96xf32>
    %cst = arith.constant dense<0.000000e+00> : vector<8x96xf32>
    %3 = tpu.matmul %1, %2, %cst {dimension_numbers = #tpu.dot_dimension_numbers<[1], [0], [0], [1], [0, 0, 1, 1], [], []>} : vector<8x32xf32>, vector<32x96xf32>, vector<8x96xf32> -> vector<8x96xf32>
    %c0_4 = arith.constant 0 : index
    %c0_5 = arith.constant 0 : index
    %4 = vector.load %arg4[%c0_4, %c0_5] : memref<1x96xf32, #tpu.memory_space<vmem>>, vector<1x96xf32>
    %5 = vector.broadcast %4 : vector<1x96xf32> to vector<8x96xf32>
    %6 = arith.addf %3, %5 : vector<8x96xf32>
    %7 = vector.extract_strided_slice %6 {offsets = [0, 0], sizes = [8, 32], strides = [1, 1]} : vector<8x96xf32> to vector<8x32xf32>
    %cst_6 = arith.constant 0.353553385 : f32
    %8 = vector.broadcast %cst_6 : f32 to vector<8x32xf32>
    %9 = arith.mulf %7, %8 : vector<8x32xf32>
    %10 = vector.extract_strided_slice %6 {offsets = [0, 32], sizes = [8, 32], strides = [1, 1]} : vector<8x96xf32> to vector<8x32xf32>
    %11 = vector.extract_strided_slice %6 {offsets = [0, 64], sizes = [8, 32], strides = [1, 1]} : vector<8x96xf32> to vector<8x32xf32>
    %12 = vector.extract_strided_slice %9 {offsets = [0, 0], sizes = [8, 8], strides = [1, 1]} : vector<8x32xf32> to vector<8x8xf32>
    %c0_7 = arith.constant 0 : index
    %c0_8 = arith.constant 0 : index
    %c0_9 = arith.constant 0 : index
    %c0_10 = arith.constant 0 : index
    %13 = vector.load %arg5[%c0_7, %c0_8, %c0_9, %c0_10] : memref<1x4x8x8xf32, #tpu.memory_space<vmem>>, vector<1x1x8x8xf32>
    %14 = vector.shape_cast %13 : vector<1x1x8x8xf32> to vector<8x8xf32>
    %15 = vector.shape_cast %12 : vector<8x8xf32> to vector<1x1x8x8xf32>
    tpu.vector_store %arg5[%c0_7, %c0_8, %c0_9, %c0_10], %15 {strides = array<i32>} : memref<1x4x8x8xf32, #tpu.memory_space<vmem>>, vector<1x1x8x8xf32>,
    %16 = vector.extract_strided_slice %10 {offsets = [0, 0], sizes = [8, 8], strides = [1, 1]} : vector<8x32xf32> to vector<8x8xf32>
    %c0_11 = arith.constant 0 : index
    %c0_12 = arith.constant 0 : index
    %c0_13 = arith.constant 0 : index
    %c0_14 = arith.constant 0 : index
    %17 = vector.load %arg6[%c0_11, %c0_12, %c0_13, %c0_14] : memref<1x4x8x8xf32, #tpu.memory_space<vmem>>, vector<1x1x8x8xf32>
    %18 = vector.shape_cast %17 : vector<1x1x8x8xf32> to vector<8x8xf32>
    %19 = vector.shape_cast %16 : vector<8x8xf32> to vector<1x1x8x8xf32>
    tpu.vector_store %arg6[%c0_11, %c0_12, %c0_13, %c0_14], %19 {strides = array<i32>} : memref<1x4x8x8xf32, #tpu.memory_space<vmem>>, vector<1x1x8x8xf32>,
    %20 = vector.extract_strided_slice %11 {offsets = [0, 0], sizes = [8, 8], strides = [1, 1]} : vector<8x32xf32> to vector<8x8xf32>
    %c0_15 = arith.constant 0 : index
    %c0_16 = arith.constant 0 : index
    %c0_17 = arith.constant 0 : index
    %c0_18 = arith.constant 0 : index
    %21 = vector.load %arg7[%c0_15, %c0_16, %c0_17, %c0_18] : memref<1x4x8x8xf32, #tpu.memory_space<vmem>>, vector<1x1x8x8xf32>
    %22 = vector.shape_cast %21 : vector<1x1x8x8xf32> to vector<8x8xf32>
    %23 = vector.shape_cast %20 : vector<8x8xf32> to vector<1x1x8x8xf32>
    tpu.vector_store %arg7[%c0_15, %c0_16, %c0_17, %c0_18], %23 {strides = array<i32>} : memref<1x4x8x8xf32, #tpu.memory_space<vmem>>, vector<1x1x8x8xf32>,
    %24 = vector.extract_strided_slice %9 {offsets = [0, 8], sizes = [8, 8], strides = [1, 1]} : vector<8x32xf32> to vector<8x8xf32>
    %c0_19 = arith.constant 0 : index
    %c1 = arith.constant 1 : index
    %c0_20 = arith.constant 0 : index
    %c0_21 = arith.constant 0 : index
    %25 = vector.load %arg5[%c0_19, %c1, %c0_20, %c0_21] : memref<1x4x8x8xf32, #tpu.memory_space<vmem>>, vector<1x1x8x8xf32>
    %26 = vector.shape_cast %25 : vector<1x1x8x8xf32> to vector<8x8xf32>
    %27 = vector.shape_cast %24 : vector<8x8xf32> to vector<1x1x8x8xf32>
    tpu.vector_store %arg5[%c0_19, %c1, %c0_20, %c0_21], %27 {strides = array<i32>} : memref<1x4x8x8xf32, #tpu.memory_space<vmem>>, vector<1x1x8x8xf32>,
    %28 = vector.extract_strided_slice %10 {offsets = [0, 8], sizes = [8, 8], strides = [1, 1]} : vector<8x32xf32> to vector<8x8xf32>
    %c0_22 = arith.constant 0 : index
    %c1_23 = arith.constant 1 : index
    %c0_24 = arith.constant 0 : index
    %c0_25 = arith.constant 0 : index
    %29 = vector.load %arg6[%c0_22, %c1_23, %c0_24, %c0_25] : memref<1x4x8x8xf32, #tpu.memory_space<vmem>>, vector<1x1x8x8xf32>
    %30 = vector.shape_cast %29 : vector<1x1x8x8xf32> to vector<8x8xf32>
    %31 = vector.shape_cast %28 : vector<8x8xf32> to vector<1x1x8x8xf32>
    tpu.vector_store %arg6[%c0_22, %c1_23, %c0_24, %c0_25], %31 {strides = array<i32>} : memref<1x4x8x8xf32, #tpu.memory_space<vmem>>, vector<1x1x8x8xf32>,
    %32 = vector.extract_strided_slice %11 {offsets = [0, 8], sizes = [8, 8], strides = [1, 1]} : vector<8x32xf32> to vector<8x8xf32>
    %c0_26 = arith.constant 0 : index
    %c1_27 = arith.constant 1 : index
    %c0_28 = arith.constant 0 : index
    %c0_29 = arith.constant 0 : index
    %33 = vector.load %arg7[%c0_26, %c1_27, %c0_28, %c0_29] : memref<1x4x8x8xf32, #tpu.memory_space<vmem>>, vector<1x1x8x8xf32>
    %34 = vector.shape_cast %33 : vector<1x1x8x8xf32> to vector<8x8xf32>
    %35 = vector.shape_cast %32 : vector<8x8xf32> to vector<1x1x8x8xf32>
    tpu.vector_store %arg7[%c0_26, %c1_27, %c0_28, %c0_29], %35 {strides = array<i32>} : memref<1x4x8x8xf32, #tpu.memory_space<vmem>>, vector<1x1x8x8xf32>,
    %36 = vector.extract_strided_slice %9 {offsets = [0, 16], sizes = [8, 8], strides = [1, 1]} : vector<8x32xf32> to vector<8x8xf32>
    %c0_30 = arith.constant 0 : index
    %c2 = arith.constant 2 : index
    %c0_31 = arith.constant 0 : index
    %c0_32 = arith.constant 0 : index
    %37 = vector.load %arg5[%c0_30, %c2, %c0_31, %c0_32] : memref<1x4x8x8xf32, #tpu.memory_space<vmem>>, vector<1x1x8x8xf32>
    %38 = vector.shape_cast %37 : vector<1x1x8x8xf32> to vector<8x8xf32>
    %39 = vector.shape_cast %36 : vector<8x8xf32> to vector<1x1x8x8xf32>
    tpu.vector_store %arg5[%c0_30, %c2, %c0_31, %c0_32], %39 {strides = array<i32>} : memref<1x4x8x8xf32, #tpu.memory_space<vmem>>, vector<1x1x8x8xf32>,
    %40 = vector.extract_strided_slice %10 {offsets = [0, 16], sizes = [8, 8], strides = [1, 1]} : vector<8x32xf32> to vector<8x8xf32>
    %c0_33 = arith.constant 0 : index
    %c2_34 = arith.constant 2 : index
    %c0_35 = arith.constant 0 : index
    %c0_36 = arith.constant 0 : index
    %41 = vector.load %arg6[%c0_33, %c2_34, %c0_35, %c0_36] : memref<1x4x8x8xf32, #tpu.memory_space<vmem>>, vector<1x1x8x8xf32>
    %42 = vector.shape_cast %41 : vector<1x1x8x8xf32> to vector<8x8xf32>
    %43 = vector.shape_cast %40 : vector<8x8xf32> to vector<1x1x8x8xf32>
    tpu.vector_store %arg6[%c0_33, %c2_34, %c0_35, %c0_36], %43 {strides = array<i32>} : memref<1x4x8x8xf32, #tpu.memory_space<vmem>>, vector<1x1x8x8xf32>,
    %44 = vector.extract_strided_slice %11 {offsets = [0, 16], sizes = [8, 8], strides = [1, 1]} : vector<8x32xf32> to vector<8x8xf32>
    %c0_37 = arith.constant 0 : index
    %c2_38 = arith.constant 2 : index
    %c0_39 = arith.constant 0 : index
    %c0_40 = arith.constant 0 : index
    %45 = vector.load %arg7[%c0_37, %c2_38, %c0_39, %c0_40] : memref<1x4x8x8xf32, #tpu.memory_space<vmem>>, vector<1x1x8x8xf32>
    %46 = vector.shape_cast %45 : vector<1x1x8x8xf32> to vector<8x8xf32>
    %47 = vector.shape_cast %44 : vector<8x8xf32> to vector<1x1x8x8xf32>
    tpu.vector_store %arg7[%c0_37, %c2_38, %c0_39, %c0_40], %47 {strides = array<i32>} : memref<1x4x8x8xf32, #tpu.memory_space<vmem>>, vector<1x1x8x8xf32>,
    %48 = vector.extract_strided_slice %9 {offsets = [0, 24], sizes = [8, 8], strides = [1, 1]} : vector<8x32xf32> to vector<8x8xf32>
    %c0_41 = arith.constant 0 : index
    %c3 = arith.constant 3 : index
    %c0_42 = arith.constant 0 : index
    %c0_43 = arith.constant 0 : index
    %49 = vector.load %arg5[%c0_41, %c3, %c0_42, %c0_43] : memref<1x4x8x8xf32, #tpu.memory_space<vmem>>, vector<1x1x8x8xf32>
    %50 = vector.shape_cast %49 : vector<1x1x8x8xf32> to vector<8x8xf32>
    %51 = vector.shape_cast %48 : vector<8x8xf32> to vector<1x1x8x8xf32>
    tpu.vector_store %arg5[%c0_41, %c3, %c0_42, %c0_43], %51 {strides = array<i32>} : memref<1x4x8x8xf32, #tpu.memory_space<vmem>>, vector<1x1x8x8xf32>,
    %52 = vector.extract_strided_slice %10 {offsets = [0, 24], sizes = [8, 8], strides = [1, 1]} : vector<8x32xf32> to vector<8x8xf32>
    %c0_44 = arith.constant 0 : index
    %c3_45 = arith.constant 3 : index
    %c0_46 = arith.constant 0 : index
    %c0_47 = arith.constant 0 : index
    %53 = vector.load %arg6[%c0_44, %c3_45, %c0_46, %c0_47] : memref<1x4x8x8xf32, #tpu.memory_space<vmem>>, vector<1x1x8x8xf32>
    %54 = vector.shape_cast %53 : vector<1x1x8x8xf32> to vector<8x8xf32>
    %55 = vector.shape_cast %52 : vector<8x8xf32> to vector<1x1x8x8xf32>
    tpu.vector_store %arg6[%c0_44, %c3_45, %c0_46, %c0_47], %55 {strides = array<i32>} : memref<1x4x8x8xf32, #tpu.memory_space<vmem>>, vector<1x1x8x8xf32>,
    %56 = vector.extract_strided_slice %11 {offsets = [0, 24], sizes = [8, 8], strides = [1, 1]} : vector<8x32xf32> to vector<8x8xf32>
    %c0_48 = arith.constant 0 : index
    %c3_49 = arith.constant 3 : index
    %c0_50 = arith.constant 0 : index
    %c0_51 = arith.constant 0 : index
    %57 = vector.load %arg7[%c0_48, %c3_49, %c0_50, %c0_51] : memref<1x4x8x8xf32, #tpu.memory_space<vmem>>, vector<1x1x8x8xf32>
    %58 = vector.shape_cast %57 : vector<1x1x8x8xf32> to vector<8x8xf32>
    %59 = vector.shape_cast %56 : vector<8x8xf32> to vector<1x1x8x8xf32>
    tpu.vector_store %arg7[%c0_48, %c3_49, %c0_50, %c0_51], %59 {strides = array<i32>} : memref<1x4x8x8xf32, #tpu.memory_space<vmem>>, vector<1x1x8x8xf32>,
    return
  }
  func.func @transform_0(%arg0: i32, %arg1: i32) -> (i32, i32, i32) {
    %c0_i32 = arith.constant 0 : i32
    %c0_i32_0 = arith.constant 0 : i32
    return %arg0, %arg1, %c0_i32 : i32, i32, i32
  }
  func.func @transform_1(%arg0: i32, %arg1: i32) -> (i32, i32) {
    %c0_i32 = arith.constant 0 : i32
    %c0_i32_0 = arith.constant 0 : i32
    %c0_i32_1 = arith.constant 0 : i32
    return %c0_i32, %c0_i32_0 : i32, i32
  }
  func.func @transform_2(%arg0: i32, %arg1: i32) -> (i32, i32) {
    %c0_i32 = arith.constant 0 : i32
    %c0_i32_0 = arith.constant 0 : i32
    %c0_i32_1 = arith.constant 0 : i32
    return %c0_i32, %c0_i32_0 : i32, i32
  }
  func.func @transform_3(%arg0: i32, %arg1: i32) -> (i32, i32, i32, i32) {
    %c0_i32 = arith.constant 0 : i32
    %c0_i32_0 = arith.constant 0 : i32
    %c0_i32_1 = arith.constant 0 : i32
    return %arg0, %c0_i32, %arg1, %c0_i32_0 : i32, i32, i32, i32
  }
  func.func @transform_4(%arg0: i32, %arg1: i32) -> (i32, i32, i32, i32) {
    %c0_i32 = arith.constant 0 : i32
    %c0_i32_0 = arith.constant 0 : i32
    %c0_i32_1 = arith.constant 0 : i32
    return %arg0, %c0_i32, %arg1, %c0_i32_0 : i32, i32, i32, i32
  }
  func.func @transform_5(%arg0: i32, %arg1: i32) -> (i32, i32, i32, i32) {
    %c0_i32 = arith.constant 0 : i32
    %c0_i32_0 = arith.constant 0 : i32
    %c0_i32_1 = arith.constant 0 : i32
    return %arg0, %c0_i32, %arg1, %c0_i32_0 : i32, i32, i32, i32
  }
}

</mosaic_0001>

<bundles_post_ra>
// kernel: tpu_custom_call.1
= control target key start
LH: loop header
LB: loop body
LE: loop exit
PB: predicated region body
PF: predicated region fallthrough
CT: control target
= control target key end

     0   :  { %s1243_s0 = inlined_call_operand.hbm [shape: f32[2,8,32], index: 0, kind: input, shape index: {}]   ;;  %s1244_s1 = inlined_call_operand.hbm [shape: f32[32,96], index: 1, kind: input, shape index: {}]   ;;  %s1245_s2 = inlined_call_operand.vmem [shape: f32[1,96], index: 2, kind: input, shape index: {}]   ;;  %s1246_s3 = inlined_call_operand.hbm [shape: f32[2,4,8,8], index: 3, kind: output, shape index: {0}]   ;;  %s1247_s4 = inlined_call_operand.hbm [shape: f32[2,4,8,8], index: 4, kind: output, shape index: {1}]   ;;  %s1248_s5 = inlined_call_operand.hbm [shape: f32[2,4,8,8], index: 5, kind: output, shape index: {2}]  }
   0x1   :  { %1252 = sst [smem:[#allocation15_spill]] %s1243_s0 }
   0x2   :  { %11 = vsyncpa [#allocation3], 0 }
   0x3   :  { %13 = vsyncpa [#allocation3 + $0x1], 0 }
   0x4   :  { %14 = vsyncpa [#allocation6], 0 }
   0x5   :  { %15 = vsyncpa [#allocation4], 0 }
   0x6   :  { %17 = vsyncpa [#allocation4 + $0x1], 0 }
   0x7   :  { %18 = vsyncpa [#allocation9], 0 }
   0x8   :  { %20 = vsyncpa [#allocation9 + $0x1], 0  ;;  %s1003_s18 = smov 0   ;;  %s1005_s19 = smov 0  }
   0x9   :  { %s1007_s20 = smov 0   ;;  %s1009_s21 = smov 0  }
   0xa   :  { %s1011_s22 = smov 0   ;;  %s1013_s23 = smov 0  }
   0xb LB: > { %s1034_s24 = sadd.s32 4294967295, %s955_s23   ;;  %p615_p0 = scmp.ge.s32.totalorder %s955_s23, 1  ;;  %s955_s23 = sphi %s1013_s23, %s26_s23   ;;  %s951_s22 = sphi %s1011_s22, %s1265_s22   ;;  %s947_s21 = sphi %s1009_s21, %s1264_s21   ;;  %s943_s20 = sphi %s1007_s20, %s1263_s20   ;;  %s939_s19 = sphi %s1005_s19, %s1262_s19   ;;  %s935_s18 = sphi %s1003_s18, %s1261_s18  }
   0xc   : > { %p61_p1 = scmp.eq.s32.totalorder %s1034_s24, 0  ;;  %p197_p2 = scmp.lt.s32.totalorder %s955_s23, 3 }
   0xd   : > { %s208_s27 = sshll.u32 %s1244_s1, 4  ;;  %s957_s29 = smov [#allocation5]   ;;  %s209_s27 = int_to_ptr.hbm [resolvable:$true] %s208_s27 }
   0xe   : > { %p1042_p3 = pnand %p615_p0, %p197_p2  ;;  %s210_s30 = sshll.u32 %s957_s29, 4  ;;  %s211_s30 = int_to_ptr.vmem [resolvable:$true] %s210_s30 }
   0xf   : > { %p617_p6 = scmp.ge.s32.totalorder %s955_s23, 2  ;;  %s958_s6 = smov 128  }
  0x10   : > { %p662_p4 = pneg %p1042_p3  ;;  %s959_s7 = smov 8  }
  0x11   : > { %s1249_s8 = sadd.s32 4294967294, %s955_s23   ;;  %s38_s9 = sadd.s32 1, %s951_s22 }
  0x12   : > { %p663_p5 = pnand %p662_p4, %p61_p1  ;;  %s47_s10 = sadd.s32 1, %s943_s20 }
  0x13   : > { %p40_p7 = scmp.ge.s32.totalorder %s38_s9, 2  ;;  %p54_p8 = scmp.ne.s32.totalorder %s943_s20, %s939_s19 }
  0x14   : > { %665 = dma.hbm_to_vmem [thread:$0]  (!%p663_p5), %s209_s27, 512, %s211_s30, [#allocation6], %s958_s6, %s958_s6, %s959_s7  }
  0x15   : > { %p55_p9 = scmp.eq.s32.totalorder %s955_s23, 0  ;;  %p60_p10 = scmp.ne.s32.totalorder %s939_s19, %s935_s18 }
  0x16   : > { %s1267_s9 = smov (%p40_p7, %s38_s9), 0  ;;  %p128_p13 = scmp.eq.s32.totalorder %s1034_s24, 1 }
  0x17   : > { %p1061_p11 = por %p55_p9, %p54_p8  ;;  %p1067_p12 = por %p61_p1, %p60_p10 }
  0x18   : > { %s42_s13 = ssub.s32 %s951_s22, %s1267_s9  ;;  %p134_p2 = scmp.eq.s32.totalorder %s1249_s8, 1 }
  0x19   : > { %p45_p0 = scmp.eq.s32.totalorder %s42_s13, 0  ;;  %p1076_p4 = por %p128_p13, %p54_p8 }
  0x1a   : > { %p681_p5 = scmp.lt.s32.totalorder %s955_s23, 2  ;;  %p1084_p7 = por %p134_p2, %p60_p10 }
  0x1b   : > { %s1082_s15 = scalar_select %p45_p0, %s943_s20, %s47_s10  }
  0x1c   : > { %s227_s17 = sand.u32 1, %s943_s20   ;;  %s619_s26 = sshll.u32 %s951_s22, 3 }
  0x1d   : > { %s618_s25 = sshll.u32 %s227_s17, 3  ;;  %s1258_s0 = sld [smem:[#allocation15_spill]] }
  0x1e   : > { %s231_s6 = scalar_lea.vmem [#allocation2], %s618_s25  ;;  %p667_p8 = pnand %p681_p5, %p1061_p11 }
  0x1f   : > { %s240_s7 = sshll.u32 %s231_s6, 4  ;;  %s228_s10 = scalar_lea.sflag [#allocation3], %s227_s17  ;;  %s241_s7 = int_to_ptr.vmem [resolvable:$true] %s240_s7 }
  0x20   : > { %s1098_s8 = sand.u32 (!%p1042_p3), 1, %s939_s19  }
  0x21   : > { %249 = sbr.rel (%p1042_p3) target bundleno = 332 (0x14c), region = 32  ;;  %s621_s27 = sshll.u32 (!%p1042_p3), %s1098_s8, 3 }
  0x22   : > { %s255_s25 = scalar_lea.vmem (!%p1042_p3), [#allocation2], %s621_s27 }
  0x23   : > { %s236_s30 = scalar_lea.hbm %s1258_s0, %s619_s26  ;;  %s252_s26 = scalar_lea.sflag (!%p1042_p3), [#allocation3], %s1098_s8 }
  0x24   : > { %s238_s13 = sshll.u32 %s236_s30, 4  ;;  %s239_s13 = int_to_ptr.hbm [resolvable:$true] %s238_s13 }
  0x25   : > { %669 = dma.hbm_to_vmem [thread:$0]  (!%p667_p8), %s239_s13, 128, %s241_s7, %s228_s10  }
  0x26   : > { %918 = dma.done.wait (%p1067_p12), %s252_s26, 128  }
  0x27   : > { %920 = vsyncadd (%p1067_p12), %s252_s26, 4294967168 }
  0x28   : > { %922 = dma.done.wait (%p61_p1), [#allocation6], 512  }
  0x29   : > { %924 = vsyncadd (%p61_p1), [#allocation6], 4294966784  ;;  %v302_v0 = vld [vmem:[#allocation5 + $0x18] sm:$0xff]  ;;  %v301_v1 = vld [vmem:[#allocation5 + $0x10] sm:$0xff]  ;;  %vm307_vm0 = vcmask 261120   ;;  %s1114_s12 = sshll.u32 %s1098_s8, 5 }
  0x2a   : > { %323 = vmatpush.msra.mxu0 %v302_v0  ;;  %v300_v2 = vld [vmem:[#allocation5 + $0x8] sm:$0xff]  ;;  %v299_v3 = vld [vmem:[#allocation5] sm:$0xff]  ;;  %v298_v4 = vld [vmem:[%s255_s25] sm:$0xff]  ;;  %vm332_vm1 = vcmask 64512   ;;  %s960_s17 = smov 64   ;;  %s961_s29 = smov 80  }
  0x2b   : > { %v748_v5 = vld [vmem:[%s1245_s2] ss:$0 sm:$0xff]  ;;  %s962_s30 = smov 96   ;;  %s1117_s6 = scalar_lea.vmem [#allocation7], %s1114_s12 }
  0x2c   : > { %324 = vmatpush.msra.mxu0 %v301_v1  ;;  %s963_s7 = smov 72   ;;  %s964_s13 = smov 120  }
  0x2d   : > { %s965_s10 = smov 88   ;;  %s966_s27 = smov 112  }
  0x2e   : > { %325 = vmatpush.msra.mxu0 %v300_v2  ;;  %s967_s26 = smov 48   ;;  %s968_s25 = smov 56  }
  0x2f   : > { %s969_s28 = smov 40   ;;  %s970_s11 = smov 104  }
  0x30   : > { %326 = vmatpush.msra.mxu0 %v299_v3 }
  0x31   : > { %626 = vmatmul.msk.f32.vlgmr.msra.gmra.mxu0 %vm307_vm0, %v298_v4 }
  0xae   : > { %v328_v6 = vpop.f32.mrf.mxu0 }
  0xaf   : > { %v329_v7 = vadd.f32 %v748_v5, %v328_v6 }
  0xb1   : > { %339 = vrot.lane.b32.xlu2 %v329_v7, %s960_s17  ;;  %364 = vrot.lane.b32.xlu1 %v329_v7, %s961_s29  ;;  %v331_v8 = vmul.f32 0.35355338, %v329_v7  ;;  %s1122_s17 = scalar_lea.vmem [#allocation10], %s1114_s12  ;;  %s1131_s29 = sshll.u32 %s947_s21, 5 }
  0xb2   : > { %335 = vrot.lane.b32.xlu0 %v329_v7, %s962_s30  ;;  %s290_s30 = scalar_lea.vmem [#allocation8], %s1114_s12 }
  0xb3   : > { %333 = vst.msk [vmem:[%s1117_s6] sm:$0xff] %vm332_vm1, %v331_v8 }
  0xb9   : > { %379 = vrot.lane.b32.xlu1 %v329_v7, %s963_s7  ;;  %344 = vrot.lane.b32.xlu2 %v331_v8, %s964_s13  ;;  %s829_s7 = scalar_lea.hbm %s1247_s4, 64 }
  0xba   : > { %349 = vrot.lane.b32.xlu0 %v329_v7, %s965_s10  ;;  %s430_s10 = scalar_lea.hbm %s1247_s4, %s1131_s29 }
  0xc1   : > { %359 = vrot.lane.b32.xlu1 %v331_v8, %s966_s27  ;;  %369 = vrot.lane.b32.xlu2 %v329_v7, %s967_s26  ;;  %s431_s27 = sshll.u32 %s290_s30, 4  ;;  %s394_s26 = sand.u32 1, %s1034_s24   ;;  %s432_s27 = int_to_ptr.vmem [resolvable:$true] %s431_s27 }
  0xc2   : > { %354 = vrot.lane.b32.xlu0 %v329_v7, %s968_s25  ;;  %s433_s25 = sshll.u32 %s430_s10, 4  ;;  %s1143_s21 = scalar_lea.sflag [#allocation9], %s394_s26  ;;  %s434_s25 = int_to_ptr.hbm [resolvable:$true] %s433_s25 }
  0xc3   : > { %s823_s12 = sshra.s32 %s434_s25, 4  ;;  %s824_s12 = int_to_ptr.hbm [resolvable:$true] %s823_s12 }
  0xc4   : > { %p830_p10 = scmp.lt.s32.totalorder %s824_s12, %s1247_s4 }
  0xc9   : > { %384 = vrot.lane.b32.xlu1 %v329_v7, %s969_s28  ;;  %s825_s28 = scalar_lea.hbm %s824_s12, 32 }
  0xca   : > { %374 = vrot.lane.b32.xlu0 %v331_v8, %s970_s11  ;;  %p826_p1 = scmp.ne.s32.totalorder %s824_s12, %s825_s28  ;;  %p831_p11 = scmp.lt.s32.totalorder %s829_s7, %s825_s28 }
  0xcc   : > { %p827_p3 = pnand %p826_p1, %p1076_p4  ;;  %p832_p12 = por %p831_p11, %p830_p10 }
  0xce   : > { %p828_p9 = pneg %p827_p3 }
  0xd0   : > { %p833_p13 = pnand %p832_p12, %p828_p9 }
 0x10b   : > { %v340_v9 = vpop.permute.xlu2 %339 }
 0x10c   : > { %342 = vst.msk [vmem:[%s1122_s17] sm:$0xff] %vm332_vm1, %v340_v9 }
 0x113   : > { %v345_v10 = vpop.permute.xlu2 %344 }
 0x114   : > { %627 = vst.msk [vmem:[%s1117_s6 + $0x8] sm:$0xff] %vm332_vm1, %v345_v10 }
 0x11b   : > { %v370_v11 = vpop.permute.xlu2 %369 }
 0x11c   : > { %632 = vst.msk [vmem:[%s1122_s17 + $0x10] sm:$0xff] %vm332_vm1, %v370_v11 }
 0x123   : > { %v365_v12 = vpop.permute.xlu1 %364 }
 0x124   : > { %631 = vst.msk [vmem:[%s290_s30 + $0x10] sm:$0xff] %vm332_vm1, %v365_v12  ;;  %v336_v13 = vpop.permute.xlu0 %335 }
 0x125   : > { %338 = vst.msk [vmem:[%s290_s30] sm:$0xff] %vm332_vm1, %v336_v13 }
 0x12b   : > { %v380_v14 = vpop.permute.xlu1 %379 }
 0x12c   : > { %634 = vst.msk [vmem:[%s290_s30 + $0x18] sm:$0xff] %vm332_vm1, %v380_v14  ;;  %v350_v15 = vpop.permute.xlu0 %349 }
 0x12d   : > { %628 = vst.msk [vmem:[%s290_s30 + $0x8] sm:$0xff] %vm332_vm1, %v350_v15 }
 0x12e   : > { %836 = shalt.err (!%p833_p13)
}
 0x12f   : > { %s1250_s30 = smov 128   ;;  %s972_s26 = smov 8  }
 0x130   : > { %657 = dma.vmem_to_hbm [thread:$0]  (%p1076_p4), %s432_s27, 512, %s434_s25, %s1143_s21, %s1250_s30, %s1250_s30, %s972_s26  }
 0x131   : > { %s412_s11 = scalar_lea.hbm %s1246_s3, %s1131_s29  ;;  %s448_s13 = scalar_lea.hbm %s1248_s5, %s1131_s29 }
 0x132   : > { %s413_s10 = sshll.u32 %s1117_s6, 4  ;;  %s1172_s0 = sshll.u32 %s412_s11, 4  ;;  %s414_s10 = int_to_ptr.vmem [resolvable:$true] %s413_s10  ;;  %s416_s0 = int_to_ptr.hbm [resolvable:$true] %s1172_s0 }
 0x133   : > { %v360_v16 = vpop.permute.xlu1 %359  ;;  %s449_s27 = sshll.u32 %s1122_s17, 4  ;;  %s1175_s25 = sshll.u32 %s448_s13, 4  ;;  %s1178_s27 = int_to_ptr.vmem [resolvable:$true] %s449_s27  ;;  %s452_s25 = int_to_ptr.hbm [resolvable:$true] %s1175_s25 }
 0x134   : > { %v355_v17 = vpop.permute.xlu0 %354  ;;  %630 = vst.msk [vmem:[%s1117_s6 + $0x10] sm:$0xff] %vm332_vm1, %v360_v16  ;;  %s390_s29 = scalar_lea.sflag [#allocation4], %s1098_s8  ;;  %s851_s12 = sshra.s32 %s416_s0, 4  ;;  %s852_s12 = int_to_ptr.hbm [resolvable:$true] %s851_s12 }
 0x135   : > { %629 = vst.msk [vmem:[%s1122_s17 + $0x8] sm:$0xff] %vm332_vm1, %v355_v17  ;;  %s853_s28 = scalar_lea.hbm %s852_s12, 32  ;;  %s857_s7 = scalar_lea.hbm %s1246_s3, 64 }
 0x136   : > { %p854_p0 = scmp.ne.s32.totalorder %s852_s12, %s853_s28  ;;  %p858_p8 = scmp.lt.s32.totalorder %s852_s12, %s1246_s3 }
 0x137   : > { %p859_p1 = scmp.lt.s32.totalorder %s857_s7, %s853_s28 }
 0x138   : > { %p855_p2 = pnand %p854_p0, %p1076_p4 }
 0x139   : > { %p860_p3 = por %p859_p1, %p858_p8 }
 0x13a   : > { %p856_p5 = pneg %p855_p2 }
 0x13b   : > { %v385_v18 = vpop.permute.xlu1 %384 }
 0x13c   : > { %v375_v19 = vpop.permute.xlu0 %374  ;;  %635 = vst.msk [vmem:[%s1122_s17 + $0x18] sm:$0xff] %vm332_vm1, %v385_v18  ;;  %p861_p9 = pnand %p860_p3, %p856_p5 }
 0x13d   : > { %633 = vst.msk [vmem:[%s1117_s6 + $0x18] sm:$0xff] %vm332_vm1, %v375_v19 }
 0x13e   : > { %864 = shalt.err (!%p861_p9)
}
 0x13f   : > { %s1259_s8 = smov 128   ;;  %s879_s6 = sshra.s32 %s452_s25, 4  ;;  %s880_s6 = int_to_ptr.hbm [resolvable:$true] %s879_s6 }
 0x140   : > { %656 = dma.vmem_to_hbm [thread:$0]  (%p1076_p4), %s414_s10, 512, %s416_s0, %s390_s29, %s1259_s8, %s1259_s8, %s972_s26  }
 0x141   : > { %s881_s17 = scalar_lea.hbm %s880_s6, 32  ;;  %s885_s28 = scalar_lea.hbm %s1248_s5, 64 }
 0x142   : > { %p882_p10 = scmp.ne.s32.totalorder %s880_s6, %s881_s17  ;;  %p886_p13 = scmp.lt.s32.totalorder %s880_s6, %s1248_s5 }
 0x143   : > { %p887_p0 = scmp.lt.s32.totalorder %s885_s28, %s881_s17 }
 0x144   : > { %p883_p11 = pnand %p882_p10, %p1076_p4 }
 0x145   : > { %p888_p2 = por %p887_p0, %p886_p13 }
 0x146   : > { %p884_p12 = pneg %p883_p11 }
 0x148   : > { %p889_p5 = pnand %p888_p2, %p884_p12 }
 0x14a   : > { %892 = shalt.err (!%p889_p5)
}
 0x14b   : > { %658 = dma.vmem_to_hbm [thread:$0]  (%p1076_p4), %s1178_s27, 512, %s452_s25, %s1143_s21, %s1259_s8, %s1259_s8, %s972_s26  }
 0x14c PF: > { %s466_s0 = sand.u32 1, %s935_s18   ;;  %p671_p8 = pnand %p617_p6, %p1084_p7 }
 0x14d   : > { %s467_s10 = scalar_lea.sflag [#allocation4], %s466_s0 }
 0x14e   : > { %p672_p1 = pneg %p671_p8 }
 0x150   : > { %926 = dma.done.wait (%p672_p1), %s467_s10, 512  }
 0x151   : > { %928 = vsyncadd (%p672_p1), %s467_s10, 4294966784  ;;  %s1260_s14 = sadd.s32 4294967294, %s955_s23  }
 0x152   : > { %s476_s29 = sand.u32 1, %s1260_s14  }
 0x153   : > { %s477_s7 = scalar_lea.sflag [#allocation9], %s476_s29 }
 0x154   : > { %930 = dma.done.wait (%p672_p1), %s477_s7, 1024  }
 0x155   : > { %932 = vsyncadd (%p672_p1), %s477_s7, 4294966272  ;;  %s26_s23 = sadd.s32 1, %s955_s23   ;;  %s1261_s18 = smov %s939_s19 }
 0x156   : > { %p23_p4 = scmp.ge.s32.totalorder %s26_s23, 4   ;;  %s1262_s19 = smov %s943_s20 }
 0x157   : > { %s1263_s20 = smov %s1082_s15  ;;  %s1264_s21 = smov %s951_s22 }
 0x158   : > { %s1265_s22 = smov %s1267_s9  ;;  %25 = sbr.rel (!%p23_p4) target bundleno = 11 (0xb), region = 122 }
 0x15d   :  { %493 = vsyncpa [#allocation3], 1 }
 0x15e   :  { %495 = vsyncpa [#allocation3 + $0x1], 1 }
 0x15f   :  { %496 = vsyncpa [#allocation6], 1 }
 0x160   :  { %497 = vsyncpa [#allocation4], 1 }
 0x161   :  { %499 = vsyncpa [#allocation4 + $0x1], 1 }
 0x162   :  { %500 = vsyncpa [#allocation9], 1 }
 0x163   :  { %502 = vsyncpa [#allocation9 + $0x1], 1 }

</bundles_post_ra>
